<compile_context>
chip_gen: v7x
topology: tpu7x:2x2x1
jax: 0.10.0
libtpu: 0.0.40
codegen_flags: <defaults>
</compile_context>

<pallas_src>
import jax
import jax.numpy as jnp
from jax.experimental import pallas as pl
from jax.experimental.pallas import tpu as pltpu

_LANE = 128
_SUBLANE = 8
_TARGET_BLOCK_BYTES = 8 * 1024 * 1024  # ~8 MiB/block -> <=32 MiB resident (v7x-safe)
_COL_CANDIDATES = (8192, 4096, 2048, 1536, 1024, 768, 512, 384, 256, 128)


# ----------------------------------------------------------------------------
# Zero-copy identity: output aliases input, refs stay in place, no DMA at all.
# ----------------------------------------------------------------------------
def _identity_noop_kernel(x_hbm_ref, o_hbm_ref):
    # Output 0 aliases input 0, so the data is already where it needs to be.
    # Intentionally empty: no HBM<->VMEM traffic is generated.
    del x_hbm_ref, o_hbm_ref


def identity(x):
    """Identity forward: returns a tensor equal to x (zero-HBM-traffic path)."""
    if x.size == 0:
        return x
    return pl.pallas_call(
        _identity_noop_kernel,
        out_shape=jax.ShapeDtypeStruct(x.shape, x.dtype),
        in_specs=[pl.BlockSpec(memory_space=pl.ANY)],
        out_specs=pl.BlockSpec(memory_space=pl.ANY),
        input_output_aliases={0: 0},
        compiler_params=pltpu.CompilerParams(has_side_effects=True),
    )(x)


# ----------------------------------------------------------------------------
# Materializing identity: tiled, lane-dense HBM streaming copy (fresh buffer).
# ----------------------------------------------------------------------------
def _copy_kernel(x_ref, o_ref):
    # Pure pass-through copy of the current VMEM tile.
    o_ref[...] = x_ref[...]


def identity_copy(x, *, target_block_bytes=_TARGET_BLOCK_BYTES):
    """Identity that materializes a fresh output buffer via a tiled copy."""
    orig_shape = x.shape
    total = int(x.size)
    if total == 0:
        return x
    itemsize = jnp.dtype(x.dtype).itemsize
    flat = x.reshape(total)

    # Lane-dense 2D view: largest candidate column count (multiple of 128,
    # including non-power-of-two widths) that divides the element count.
    cols = None
    for c in _COL_CANDIDATES:
        if total % c == 0:
            cols = c
            break

    padded_total = total
    if cols is None:
        # Element count is not a multiple of 128: pad the flat view to a
        # (sublane x lane)-aligned size and slice after the call.  Keeps every
        # store a full-lane vst and never stages the whole array in VMEM.
        cols = _LANE
        padded_total = int(pl.cdiv(total, _SUBLANE * _LANE)) * (_SUBLANE * _LANE)
        flat = jnp.pad(flat, (0, padded_total - total))
    rows = padded_total // cols

    # Block rows: ~8 MiB per block (sublane-aligned); non-divisible row counts
    # are handled by a cdiv grid with a masked tail block.
    row_bytes = cols * itemsize
    max_rows = max(_SUBLANE, (target_block_bytes // row_bytes) // _SUBLANE * _SUBLANE)
    block_rows = rows if rows <= max_rows else max_rows
    grid = (int(pl.cdiv(rows, block_rows)),)
    block_bytes = block_rows * row_bytes

    x2 = flat.reshape(rows, cols)
    out = pl.pallas_call(
        _copy_kernel,
        out_shape=jax.ShapeDtypeStruct((rows, cols), x.dtype),
        grid=grid,
        in_specs=[pl.BlockSpec((block_rows, cols), lambda i: (i, 0))],
        out_specs=pl.BlockSpec((block_rows, cols), lambda i: (i, 0)),
        compiler_params=pltpu.CompilerParams(
            dimension_semantics=("parallel",),
            # 2x in + 2x out double-buffered blocks plus headroom.
            vmem_limit_bytes=min(int(4 * block_bytes) + (16 << 20), 100 << 20),
        ),
    )(x2)

    out_flat = out.reshape(padded_total)
    if padded_total != total:
        out_flat = out_flat[:total]
    return out_flat.reshape(orig_shape)


if __name__ == "__main__":
    key = jax.random.PRNGKey(0)
    k1, k2, k3, k4 = jax.random.split(key, 4)

    # Primary zero-copy path -- typical small NCHW input for the module.
    x = jax.random.normal(k1, (2, 4, 16, 16), dtype=jnp.float32)
    y = identity(x)
    jax.block_until_ready(y)
    assert y.shape == x.shape and y.dtype == x.dtype
    assert bool(jnp.all(y == x))

    # Zero-copy path has no shape/dtype constraints (nothing tiled or moved).
    xo = jax.random.normal(k2, (3, 5, 7, 11), dtype=jnp.float32)
    yo0 = identity(xo)
    jax.block_until_ready(yo0)
    assert bool(jnp.all(yo0 == xo))

    xb = jax.random.normal(k3, (2, 8, 32), dtype=jnp.bfloat16)
    yb = identity(xb)
    jax.block_until_ready(yb)
    assert yb.dtype == xb.dtype and bool(jnp.all(yb == xb))

    # Materializing-copy variant: single-block path ...
    yc = identity_copy(x)
    jax.block_until_ready(yc)
    assert bool(jnp.all(yc == x))

    # ... multi-block path with a masked tail block (rows=10, block_rows=8,
    # grid=2; small target_block_bytes just to exercise the code path) ...
    xt = jax.random.normal(k4, (2, 20, 384), dtype=jnp.float32)
    yt = identity_copy(xt, target_block_bytes=24 * 1024)
    jax.block_until_ready(yt)
    assert yt.shape == xt.shape and bool(jnp.all(yt == xt))

    # ... and the padded odd-element-count path (1155 elems -> pad to 2048).
    yo = identity_copy(xo)
    jax.block_until_ready(yo)
    assert bool(jnp.all(yo == xo))

    print("KERNEL_OK")
</pallas_src>

<mosaic_0001>
module attributes {stable_mosaic.version = 11 : i64} {
  func.func @_identity_noop_kernel(%arg0: memref<2x4x16x16xf32, #tpu.memory_space<any>>, %arg1: memref<2x4x16x16xf32, #tpu.memory_space<any>>) attributes {dimension_semantics = [], scalar_prefetch = 0 : i64, scratch_operands = 0 : i64, tpu.core_type = #tpu.core_type<tc>} {
    return
  }
}

</mosaic_0001>

<bundles_post_ra>
// kernel: tpu_custom_call.1
= control target key start
LH: loop header
LB: loop body
LE: loop exit
PB: predicated region body
PF: predicated region fallthrough
CT: control target
= control target key end

     0   :  { %s16_s0 = inlined_call_operand.hbm [shape: f32[2,4,16,16], index: 0, kind: input, shape index: {}, may-alias: {0,1}]   ;;  %s17_s1 = inlined_call_operand.hbm [shape: f32[2,4,16,16], index: 1, kind: output, shape index: {}, may-alias: {0,1}]  }

</bundles_post_ra>
